<compile_context>
chip_gen: v5e
topology: v5e:2x2
jax: 0.10.0
libtpu: 0.0.40
codegen_flags: <defaults>
</compile_context>

<pallas_src>
import functools

import numpy as np
import jax
import jax.numpy as jnp
from jax.experimental import pallas as pl
from jax.experimental.pallas import tpu as pltpu


VMEM_LIMIT_BYTES = 48 * 1024 * 1024   # > 32 MiB default scope, < v7x's 64 MiB physical


def mhsa_kernel(x_ref, wqkv_ref, bqkv_ref, wo_ref, bo_ref, mask_ref,
                o_ref, qkv_ref, *, n_spatial, tb):
    C = o_ref.shape[0]
    N = n_spatial
    mxu_dtype = wqkv_ref.dtype

    # Fused Q/K/V projection: one MXU push (3C x C x TB*N), bf16 operands,
    # f32 accumulation.  x is NOT kept live past this point (re-read later).
    x_lo = x_ref[...].astype(mxu_dtype)                       # (C, lanes)
    qkv = jnp.dot(wqkv_ref[...], x_lo,
                  preferred_element_type=jnp.float32)         # (3C, lanes) f32
    qkv_ref[...] = (qkv + bqkv_ref[...]).astype(qkv_ref.dtype)

    # Hoisted block-diagonal head mask (additive -1e30 bias), loaded once.
    mask = mask_ref[...]                                      # (C, C) f32

    # Per packed batch element: one clean 2-D score matmul (MXU), operands
    # sliced straight from the bf16 qkv scratch (bounded live ranges).
    # 1/sqrt(head_dim) is already folded into the query weights.
    s_blocks = []
    for b in range(tb):
        lo = b * N
        qb = qkv_ref[0 * C:1 * C, lo:lo + N]
        kb = qkv_ref[1 * C:2 * C, lo:lo + N]
        s_b = jax.lax.dot_general(qb, kb, (((1,), (1,)), ((), ())),
                                  preferred_element_type=jnp.float32)
        s_blocks.append(s_b + mask)

    # One wide, numerically stable softmax over the stacked (tb*C, C) slab
    # instead of tb tiny serial softmaxes (keeps XLU/EUP pipelines full).
    s = jnp.concatenate(s_blocks, axis=0)
    s = s - jnp.max(s, axis=-1, keepdims=True)
    e = jnp.exp(s)
    inv = pl.reciprocal(jnp.sum(e, axis=-1, keepdims=True), approx=True)
    attn = (e * inv).astype(mxu_dtype)                        # bf16 MXU operand

    # Per-b PV matmuls; results kept as bf16 values (no y scratch round trip)
    # and concatenated into one lane-dense slab for the output projection.
    y_blocks = []
    for b in range(tb):
        lo = b * N
        vb = qkv_ref[2 * C:3 * C, lo:lo + N]
        y_b = jnp.dot(attn[b * C:(b + 1) * C, :], vb,
                      preferred_element_type=jnp.float32)
        y_blocks.append(y_b.astype(mxu_dtype))
    y = jnp.concatenate(y_blocks, axis=1)                     # (C, lanes) bf16

    # out = (gamma * Wo) @ y + bo + x   (gamma folded into Wo in the wrapper).
    # x is re-read in f32 right before the residual add (exact residual).
    out = jnp.dot(wo_ref[...], y, preferred_element_type=jnp.float32)
    o_ref[...] = (out + bo_ref[...] + x_ref[...]).astype(o_ref.dtype)


def _max_lanes_for_vmem(C, mxu_bytes=2, budget=VMEM_LIMIT_BYTES):
    """VMEM-derived cap on the lane width of one grid step."""
    # Per-lane bytes: x in (f32, double-buffered) + out (f32, double-buffered)
    # + qkv scratch (mxu dtype) + slack for live values (y, scores, exp).
    per_lane = C * (2 * 4 + 2 * 4 + 3 * mxu_bytes + 8)
    lanes = int(0.75 * budget) // per_lane
    return max(128, (lanes // 128) * 128)


def _pick_batch_block(B, N, *, target_lanes=512, max_lanes=8192):
    """Pick TB (batch elements packed per grid step along the lane axis).

    Preference order:
      1. lane-dense slabs (tb*N % 128 == 0) within the VMEM-derived cap,
      2. leave >= 2 grid steps so v7x's two TensorCores both get work,
      3. the widest such slab not exceeding target_lanes (else the narrowest
         above it).
    Fallback is tb == B: a full-extent lane block, which is always a legal
    BlockSpec (never a non-full, non-multiple-of-128 width).
    """
    cands = []
    for tb in range(1, B + 1):
        if B % tb:
            continue
        lanes = tb * N
        if lanes > max_lanes:
            break
        if lanes % 128 == 0:
            cands.append(tb)
    if not cands:
        return B
    multi = [tb for tb in cands if B // tb >= 2]
    pool = multi if multi else cands
    under = [tb for tb in pool if tb * N <= target_lanes]
    return max(under) if under else min(pool)


def multihead_self_attention(x, params, num_heads=8, mxu_dtype=jnp.bfloat16):
    """x: (B, C, W, H) float32 -> (B, C, W, H) float32."""
    B, C, W, H = x.shape
    N = W * H
    hd = C // num_heads
    scale = 1.0 / float(np.sqrt(hd))

    # Channel permutation folded into the weights so the kernel sees channels
    # in (head_dim, num_heads) order: new channel d*num_heads + h <- h*hd + d.
    perm = np.array([h * hd + d for d in range(hd) for h in range(num_heads)],
                    dtype=np.int32)

    # Fused QKV weight / bias (row-permuted); 1/sqrt(hd) folded into the query.
    wqkv = jnp.concatenate([params['wq'][perm, :] * scale,
                            params['wk'][perm, :],
                            params['wv'][perm, :]], axis=0).astype(mxu_dtype)
    bqkv = jnp.concatenate([params['bq'][perm] * scale,
                            params['bk'][perm],
                            params['bv'][perm]],
                           axis=0).reshape(3 * C, 1).astype(jnp.float32)

    # gamma folded into the (column-permuted) output projection.
    wo = (params['gamma'][0] * params['wo'][:, perm]).astype(mxu_dtype)
    bo = params['bo'].reshape(C, 1).astype(jnp.float32)

    # Hoisted block-diagonal head mask (channels sharing index // num_heads
    # belong to the same head_dim slice and attend to each other).
    d_idx = np.arange(C) // num_heads
    mask = jnp.asarray(
        np.where(d_idx[:, None] == d_idx[None, :], 0.0, -1e30).astype(np.float32))

    # Pack batch elements along the lane axis: (C, B*N) slab, TB per grid step.
    mxu_bytes = jnp.dtype(mxu_dtype).itemsize
    max_lanes = _max_lanes_for_vmem(C, mxu_bytes=mxu_bytes)
    tb = _pick_batch_block(B, N, target_lanes=512, max_lanes=max_lanes)
    lanes = tb * N
    x_packed = jnp.transpose(x.reshape(B, C, N), (1, 0, 2)).reshape(C, B * N)

    kernel = functools.partial(mhsa_kernel, n_spatial=N, tb=tb)

    grid_spec = pltpu.PrefetchScalarGridSpec(
        num_scalar_prefetch=0,
        grid=(B // tb,),
        in_specs=[
            pl.BlockSpec((C, lanes), lambda bb: (0, bb)),       # x slab (f32)
            pl.BlockSpec((3 * C, C), lambda bb: (0, 0)),        # fused wqkv (bf16)
            pl.BlockSpec((3 * C, 1), lambda bb: (0, 0)),        # fused bqkv (f32)
            pl.BlockSpec((C, C), lambda bb: (0, 0)),            # wo (gamma-scaled, bf16)
            pl.BlockSpec((C, 1), lambda bb: (0, 0)),            # bo (f32)
            pl.BlockSpec((C, C), lambda bb: (0, 0)),            # head mask (f32)
        ],
        out_specs=pl.BlockSpec((C, lanes), lambda bb: (0, bb)),
        scratch_shapes=[pltpu.VMEM((3 * C, lanes), mxu_dtype)],  # qkv staging
    )

    out_packed = pl.pallas_call(
        kernel,
        out_shape=jax.ShapeDtypeStruct((C, B * N), jnp.float32),
        grid_spec=grid_spec,
        compiler_params=pltpu.CompilerParams(
            dimension_semantics=("parallel",),
            vmem_limit_bytes=VMEM_LIMIT_BYTES),
    )(x_packed, wqkv, bqkv, wo, bo, mask)

    out = jnp.transpose(out_packed.reshape(C, B, N), (1, 0, 2))
    return out.reshape(B, C, W, H)


def ref_forward(x, params, num_heads=8):
    """Pure-JAX f32 mirror of the PyTorch forward (for verification)."""
    B, C, W, H = x.shape
    N = W * H
    hd = C // num_heads
    xf = x.reshape(B, C, N)

    def proj(w, b):
        return jnp.einsum('oc,bcn->bon', w, xf) + b[None, :, None]

    Q = proj(params['wq'], params['bq']).reshape(B, num_heads, hd, N)
    K = proj(params['wk'], params['bk']).reshape(B, num_heads, hd, N)
    V = proj(params['wv'], params['bv']).reshape(B, num_heads, hd, N)

    Qp = jnp.transpose(Q, (0, 2, 1, 3))           # (B, hd, nh, N)
    Kp = jnp.transpose(K, (0, 2, 3, 1))           # (B, hd, N, nh)
    Vp = jnp.transpose(V, (0, 2, 1, 3))           # (B, hd, nh, N)

    attn = jax.nn.softmax(jnp.matmul(Qp, Kp) / (hd ** 0.5), axis=-1)
    y = jnp.matmul(attn, Vp)                      # (B, hd, nh, N)
    y = jnp.transpose(y, (0, 2, 1, 3)).reshape(B, C, N)

    gy = params['gamma'][0] * y
    out = jnp.einsum('oc,bcn->bon', params['wo'], gy) + params['bo'][None, :, None]
    return out.reshape(B, C, W, H) + x


if __name__ == "__main__":
    # B=4 so tb=2 gives a lane-dense (128) slab AND a 2-step "parallel" grid
    # (shardable across v7x's two TensorCores).
    B, C, W, H = 4, 32, 8, 8
    num_heads = 8

    key = jax.random.PRNGKey(0)
    keys = jax.random.split(key, 10)

    x = jax.random.normal(keys[0], (B, C, W, H), dtype=jnp.float32)
    params = {
        'wq': jax.random.normal(keys[1], (C, C), dtype=jnp.float32) * 0.1,
        'bq': jax.random.normal(keys[2], (C,), dtype=jnp.float32) * 0.1,
        'wk': jax.random.normal(keys[3], (C, C), dtype=jnp.float32) * 0.1,
        'bk': jax.random.normal(keys[4], (C,), dtype=jnp.float32) * 0.1,
        'wv': jax.random.normal(keys[5], (C, C), dtype=jnp.float32) * 0.1,
        'bv': jax.random.normal(keys[6], (C,), dtype=jnp.float32) * 0.1,
        'wo': jax.random.normal(keys[7], (C, C), dtype=jnp.float32) * 0.1,
        'bo': jax.random.normal(keys[8], (C,), dtype=jnp.float32) * 0.1,
        # PyTorch inits gamma = 0 (residual dominates); use a nonzero value so
        # the attention path actually contributes in this synthetic test.
        'gamma': jnp.array([0.5], dtype=jnp.float32),
    }

    out = multihead_self_attention(x, params, num_heads=num_heads)
    out = jax.block_until_ready(out)

    expected = ref_forward(x, params, num_heads=num_heads)
    # Tolerance accounts for bf16 MXU operands (per perf review) and the
    # approximate EUP reciprocal; all accumulation / softmax / residual math
    # stays f32, so the residual path is exact.
    np.testing.assert_allclose(np.asarray(out), np.asarray(expected),
                               rtol=2e-2, atol=2e-2)
    print("KERNEL_OK")
</pallas_src>

<mosaic_0001>
module attributes {stable_mosaic.version = 11 : i64} {
  func.func @mhsa_kernel(%arg0: i32, %arg1: memref<32x128xf32, #tpu.memory_space<vmem>>, %arg2: memref<96x32xbf16, #tpu.memory_space<vmem>>, %arg3: memref<96x1xf32, #tpu.memory_space<vmem>>, %arg4: memref<32x32xbf16, #tpu.memory_space<vmem>>, %arg5: memref<32x1xf32, #tpu.memory_space<vmem>>, %arg6: memref<32x32xf32, #tpu.memory_space<vmem>>, %arg7: memref<32x128xf32, #tpu.memory_space<vmem>>, %arg8: memref<96x128xbf16, #tpu.memory_space<vmem>>) attributes {dimension_semantics = [#tpu.dimension_semantics<parallel>], iteration_bounds = array<i64: 2>, scalar_prefetch = 0 : i64, scratch_operands = 1 : i64, tpu.core_type = #tpu.core_type<tc>, window_params = [{transform_indices = @transform_0, window_bounds = array<i64: 32, 128>}, {pipeline_mode = #tpu.pipeline_mode<synchronous>, transform_indices = @transform_1, window_bounds = array<i64: 96, 32>}, {pipeline_mode = #tpu.pipeline_mode<synchronous>, transform_indices = @transform_2, window_bounds = array<i64: 96, 1>}, {pipeline_mode = #tpu.pipeline_mode<synchronous>, transform_indices = @transform_3, window_bounds = array<i64: 32, 32>}, {pipeline_mode = #tpu.pipeline_mode<synchronous>, transform_indices = @transform_4, window_bounds = array<i64: 32, 1>}, {pipeline_mode = #tpu.pipeline_mode<synchronous>, transform_indices = @transform_5, window_bounds = array<i64: 32, 32>}, {transform_indices = @transform_6, window_bounds = array<i64: 32, 128>}]} {
    %c0 = arith.constant 0 : index
    %c0_0 = arith.constant 0 : index
    %0 = vector.load %arg1[%c0, %c0_0] : memref<32x128xf32, #tpu.memory_space<vmem>>, vector<32x128xf32>
    %1 = arith.truncf %0 : vector<32x128xf32> to vector<32x128xbf16>
    %c0_1 = arith.constant 0 : index
    %c0_2 = arith.constant 0 : index
    %2 = vector.load %arg2[%c0_1, %c0_2] : memref<96x32xbf16, #tpu.memory_space<vmem>>, vector<96x32xbf16>
    %cst = arith.constant dense<0.000000e+00> : vector<96x128xf32>
    %3 = tpu.matmul %2, %1, %cst {dimension_numbers = #tpu.dot_dimension_numbers<[1], [0], [0], [1], [0, 0, 1, 1], [], []>} : vector<96x32xbf16>, vector<32x128xbf16>, vector<96x128xf32> -> vector<96x128xf32>
    %c0_3 = arith.constant 0 : index
    %c0_4 = arith.constant 0 : index
    %4 = vector.load %arg3[%c0_3, %c0_4] : memref<96x1xf32, #tpu.memory_space<vmem>>, vector<96x1xf32>
    %5 = vector.broadcast %4 : vector<96x1xf32> to vector<96x128xf32>
    %6 = arith.addf %3, %5 : vector<96x128xf32>
    %7 = arith.truncf %6 : vector<96x128xf32> to vector<96x128xbf16>
    %c0_5 = arith.constant 0 : index
    %c0_6 = arith.constant 0 : index
    %8 = vector.load %arg8[%c0_5, %c0_6] : memref<96x128xbf16, #tpu.memory_space<vmem>>, vector<96x128xbf16>
    tpu.vector_store %arg8[%c0_5, %c0_6], %7 {strides = array<i32>} : memref<96x128xbf16, #tpu.memory_space<vmem>>, vector<96x128xbf16>,
    %c0_7 = arith.constant 0 : index
    %c0_8 = arith.constant 0 : index
    %9 = vector.load %arg6[%c0_7, %c0_8] : memref<32x32xf32, #tpu.memory_space<vmem>>, vector<32x32xf32>
    %c0_9 = arith.constant 0 : index
    %c0_10 = arith.constant 0 : index
    %10 = vector.load %arg8[%c0_9, %c0_10] : memref<96x128xbf16, #tpu.memory_space<vmem>>, vector<32x64xbf16>
    %c32 = arith.constant 32 : index
    %c0_11 = arith.constant 0 : index
    %11 = vector.load %arg8[%c32, %c0_11] : memref<96x128xbf16, #tpu.memory_space<vmem>>, vector<32x64xbf16>
    %cst_12 = arith.constant dense<0.000000e+00> : vector<32x32xf32>
    %12 = tpu.matmul %10, %11, %cst_12 {dimension_numbers = #tpu.dot_dimension_numbers<[1], [1], [0], [0], [0, 0, 1, 0], [], []>} : vector<32x64xbf16>, vector<32x64xbf16>, vector<32x32xf32> -> vector<32x32xf32>
    %13 = arith.addf %12, %9 : vector<32x32xf32>
    %c0_13 = arith.constant 0 : index
    %c64 = arith.constant 64 : index
    %14 = vector.load %arg8[%c0_13, %c64] : memref<96x128xbf16, #tpu.memory_space<vmem>>, vector<32x64xbf16>
    %c32_14 = arith.constant 32 : index
    %c64_15 = arith.constant 64 : index
    %15 = vector.load %arg8[%c32_14, %c64_15] : memref<96x128xbf16, #tpu.memory_space<vmem>>, vector<32x64xbf16>
    %cst_16 = arith.constant dense<0.000000e+00> : vector<32x32xf32>
    %16 = tpu.matmul %14, %15, %cst_16 {dimension_numbers = #tpu.dot_dimension_numbers<[1], [1], [0], [0], [0, 0, 1, 0], [], []>} : vector<32x64xbf16>, vector<32x64xbf16>, vector<32x32xf32> -> vector<32x32xf32>
    %17 = arith.addf %16, %9 : vector<32x32xf32>
    %18 = tpu.concatenate %13, %17 in 0 : vector<32x32xf32>, vector<32x32xf32> -> vector<64x32xf32>
    %cst_17 = arith.constant dense<0xFF800000> : vector<64xf32>
    %19 = vector.multi_reduction <maximumf>, %18, %cst_17 [1] : vector<64x32xf32> to vector<64xf32>
    %20 = vector.shape_cast %19 : vector<64xf32> to vector<64x1xf32>
    %21 = vector.broadcast %20 : vector<64x1xf32> to vector<64x32xf32>
    %22 = arith.subf %18, %21 : vector<64x32xf32>
    %23 = math.exp %22 : vector<64x32xf32>
    %cst_18 = arith.constant dense<0.000000e+00> : vector<64xf32>
    %24 = vector.multi_reduction <add>, %23, %cst_18 [1] : vector<64x32xf32> to vector<64xf32>
    %25 = vector.shape_cast %24 : vector<64xf32> to vector<64x1xf32>
    %26 = tpu.reciprocal %25 {approx = true} : vector<64x1xf32> -> vector<64x1xf32>
    %27 = vector.broadcast %26 : vector<64x1xf32> to vector<64x32xf32>
    %28 = arith.mulf %23, %27 : vector<64x32xf32>
    %29 = arith.truncf %28 : vector<64x32xf32> to vector<64x32xbf16>
    %c64_19 = arith.constant 64 : index
    %c0_20 = arith.constant 0 : index
    %30 = vector.load %arg8[%c64_19, %c0_20] : memref<96x128xbf16, #tpu.memory_space<vmem>>, vector<32x64xbf16>
    %31 = vector.extract_strided_slice %29 {offsets = [0, 0], sizes = [32, 32], strides = [1, 1]} : vector<64x32xbf16> to vector<32x32xbf16>
    %cst_21 = arith.constant dense<0.000000e+00> : vector<32x64xf32>
    %32 = tpu.matmul %31, %30, %cst_21 {dimension_numbers = #tpu.dot_dimension_numbers<[1], [0], [0], [1], [0, 0, 1, 1], [], []>} : vector<32x32xbf16>, vector<32x64xbf16>, vector<32x64xf32> -> vector<32x64xf32>
    %33 = arith.truncf %32 : vector<32x64xf32> to vector<32x64xbf16>
    %c64_22 = arith.constant 64 : index
    %c64_23 = arith.constant 64 : index
    %34 = vector.load %arg8[%c64_22, %c64_23] : memref<96x128xbf16, #tpu.memory_space<vmem>>, vector<32x64xbf16>
    %35 = vector.extract_strided_slice %29 {offsets = [32, 0], sizes = [32, 32], strides = [1, 1]} : vector<64x32xbf16> to vector<32x32xbf16>
    %cst_24 = arith.constant dense<0.000000e+00> : vector<32x64xf32>
    %36 = tpu.matmul %35, %34, %cst_24 {dimension_numbers = #tpu.dot_dimension_numbers<[1], [0], [0], [1], [0, 0, 1, 1], [], []>} : vector<32x32xbf16>, vector<32x64xbf16>, vector<32x64xf32> -> vector<32x64xf32>
    %37 = arith.truncf %36 : vector<32x64xf32> to vector<32x64xbf16>
    %38 = tpu.concatenate %33, %37 in 1 : vector<32x64xbf16>, vector<32x64xbf16> -> vector<32x128xbf16>
    %c0_25 = arith.constant 0 : index
    %c0_26 = arith.constant 0 : index
    %39 = vector.load %arg4[%c0_25, %c0_26] : memref<32x32xbf16, #tpu.memory_space<vmem>>, vector<32x32xbf16>
    %cst_27 = arith.constant dense<0.000000e+00> : vector<32x128xf32>
    %40 = tpu.matmul %39, %38, %cst_27 {dimension_numbers = #tpu.dot_dimension_numbers<[1], [0], [0], [1], [0, 0, 1, 1], [], []>} : vector<32x32xbf16>, vector<32x128xbf16>, vector<32x128xf32> -> vector<32x128xf32>
    %c0_28 = arith.constant 0 : index
    %c0_29 = arith.constant 0 : index
    %41 = vector.load %arg5[%c0_28, %c0_29] : memref<32x1xf32, #tpu.memory_space<vmem>>, vector<32x1xf32>
    %42 = vector.broadcast %41 : vector<32x1xf32> to vector<32x128xf32>
    %43 = arith.addf %40, %42 : vector<32x128xf32>
    %c0_30 = arith.constant 0 : index
    %c0_31 = arith.constant 0 : index
    %44 = vector.load %arg1[%c0_30, %c0_31] : memref<32x128xf32, #tpu.memory_space<vmem>>, vector<32x128xf32>
    %45 = arith.addf %43, %44 : vector<32x128xf32>
    %c0_32 = arith.constant 0 : index
    %c0_33 = arith.constant 0 : index
    %46 = vector.load %arg7[%c0_32, %c0_33] : memref<32x128xf32, #tpu.memory_space<vmem>>, vector<32x128xf32>
    tpu.vector_store %arg7[%c0_32, %c0_33], %45 {strides = array<i32>} : memref<32x128xf32, #tpu.memory_space<vmem>>, vector<32x128xf32>,
    return
  }
  func.func @transform_0(%arg0: i32) -> (i32, i32) {
    %c0_i32 = arith.constant 0 : i32
    %c0_i32_0 = arith.constant 0 : i32
    return %c0_i32, %arg0 : i32, i32
  }
  func.func @transform_1(%arg0: i32) -> (i32, i32) {
    %c0_i32 = arith.constant 0 : i32
    %c0_i32_0 = arith.constant 0 : i32
    %c0_i32_1 = arith.constant 0 : i32
    return %c0_i32, %c0_i32_0 : i32, i32
  }
  func.func @transform_2(%arg0: i32) -> (i32, i32) {
    %c0_i32 = arith.constant 0 : i32
    %c0_i32_0 = arith.constant 0 : i32
    %c0_i32_1 = arith.constant 0 : i32
    return %c0_i32, %c0_i32_0 : i32, i32
  }
  func.func @transform_3(%arg0: i32) -> (i32, i32) {
    %c0_i32 = arith.constant 0 : i32
    %c0_i32_0 = arith.constant 0 : i32
    %c0_i32_1 = arith.constant 0 : i32
    return %c0_i32, %c0_i32_0 : i32, i32
  }
  func.func @transform_4(%arg0: i32) -> (i32, i32) {
    %c0_i32 = arith.constant 0 : i32
    %c0_i32_0 = arith.constant 0 : i32
    %c0_i32_1 = arith.constant 0 : i32
    return %c0_i32, %c0_i32_0 : i32, i32
  }
  func.func @transform_5(%arg0: i32) -> (i32, i32) {
    %c0_i32 = arith.constant 0 : i32
    %c0_i32_0 = arith.constant 0 : i32
    %c0_i32_1 = arith.constant 0 : i32
    return %c0_i32, %c0_i32_0 : i32, i32
  }
  func.func @transform_6(%arg0: i32) -> (i32, i32) {
    %c0_i32 = arith.constant 0 : i32
    %c0_i32_0 = arith.constant 0 : i32
    return %c0_i32, %arg0 : i32, i32
  }
}

</mosaic_0001>

<bundles_post_ra>
// kernel: tpu_custom_call.1
= control target key start
LH: loop header
LB: loop body
LE: loop exit
PB: predicated region body
PF: predicated region fallthrough
CT: control target
= control target key end

     0   :  { %11 = vsyncpa [#allocation5], 0  ;;  %s1582_s0 = inlined_call_operand.vmem [shape: f32[32,256], index: 0, kind: input, shape index: {}]   ;;  %s1583_s1 = inlined_call_operand.vmem [shape: bf16[96,32], index: 1, kind: input, shape index: {}]   ;;  %s1584_s2 = inlined_call_operand.vmem [shape: f32[96,1], index: 2, kind: input, shape index: {}]   ;;  %s1585_s3 = inlined_call_operand.vmem [shape: bf16[32,32], index: 3, kind: input, shape index: {}]   ;;  %s1586_s4 = inlined_call_operand.vmem [shape: f32[32,1], index: 4, kind: input, shape index: {}]   ;;  %s1587_s5 = inlined_call_operand.vmem [shape: f32[32,32], index: 5, kind: input, shape index: {}]   ;;  %s1588_s6 = inlined_call_operand.hbm [shape: f32[32,256], index: 6, kind: output, shape index: {}]  }
   0x1   :  { %13 = vsyncpa [#allocation5 + $0x1], 0  ;;  %s1307_s21 = smov 0   ;;  %s1309_s22 = smov 0  }
   0x2   :  { %s1311_s23 = smov 0   ;;  %s1313_s24 = smov 0  }
   0x3 LB: > { %s988_s25 = sadd.s32 4294967295, %s1265_s24   ;;  %s989_s26 = sadd.s32 4294967294, %s1265_s24   ;;  %s1265_s24 = sphi %s1313_s24, %s1594_s24   ;;  %s1261_s23 = sphi %s1311_s23, %s1593_s23   ;;  %s1257_s22 = sphi %s1309_s22, %s1592_s22   ;;  %s1253_s21 = sphi %s1307_s21, %s1591_s21  }
   0x4   : > { %s1330_s27 = sadd.s32 1, %s1265_s24   ;;  %s26_s28 = sadd.s32 1, %s1261_s23 }
   0x5   : > { %s23_s29 = ssub.s32 %s1265_s24, %s1330_s27  ;;  %p33_p0 = scmp.ne.s32.totalorder %s1261_s23, %s1257_s22 }
   0x6   : > { %p24_p1 = scmp.eq.s32.totalorder %s23_s29, 0  ;;  %p34_p2 = scmp.eq.s32.totalorder %s1265_s24, 0 }
   0x7   : > { %p168_p3 = scmp.eq.s32.totalorder %s988_s25, 1  ;;  %p173_p4 = scmp.ne.s32.totalorder %s1257_s22, %s1253_s21 }
   0x8   : > { %s1343_s30 = scalar_select %p24_p1, %s1261_s23, %s26_s28  }
   0x9   : > { %p35_p5 = por %p34_p2, %p33_p0  ;;  %p1345_p6 = por %p168_p3, %p33_p0 }
   0xa   : > { %p174_p7 = scmp.eq.s32.totalorder %s989_s26, 1  ;;  %p991_p9 = scmp.ge.s32.totalorder %s1265_s24, 2 }
   0xc   : > { %p1349_p8 = por %p174_p7, %p173_p4  ;;  %205 = sbr.rel (%p991_p9) target bundleno = 25 (0x19), region = 36 }
  0x11   : > { %208 = sbr.rel (!%p35_p5) target bundleno = 25 (0x19), region = 40  ;;  %s210_s9 = sand.u32 (%p35_p5), 1, %s1261_s23  }
  0x12   : > { %s993_s10 = sshll.u32 (%p35_p5), %s1265_s24, 3  ;;  %s992_s11 = sshll.u32 (%p35_p5), %s210_s9, 5 }
  0x13   : > { %s214_s14 = scalar_lea.vmem (%p35_p5), %s1582_s0, %s993_s10  ;;  %s212_s15 = scalar_lea.vmem (%p35_p5), [#allocation3], %s992_s11 }
  0x14   : > { %v249_v0 = vld [vmem:[%s214_s14] sm:$0xff] (%p35_p5)  ;;  %v251_v1 = vld [vmem:[%s214_s14 + $0x10] sm:$0xff] (%p35_p5) }
  0x15   : > { %v253_v2 = vld [vmem:[%s214_s14 + $0x20] sm:$0xff] (%p35_p5)  ;;  %250 = vst [vmem:[%s212_s15] sm:$0xff] (%p35_p5), %v249_v0  ;;  %v255_v3 = vld [vmem:[%s214_s14 + $0x30] sm:$0xff] (%p35_p5) }
  0x16   : > { %252 = vst [vmem:[%s212_s15 + $0x8] sm:$0xff] %v251_v1 }
  0x17   : > { %254 = vst [vmem:[%s212_s15 + $0x10] sm:$0xff] %v253_v2 }
  0x18   : > { %256 = vst [vmem:[%s212_s15 + $0x18] sm:$0xff] %v255_v3 }
  0x19 PF: > { %p994_p10 = scmp.ge.s32.totalorder %s1265_s24, 1  ;;  %p261_p11 = scmp.lt.s32.totalorder %s1265_s24, 3 }
  0x1b   : > { %p262_p12 = pnand %p994_p10, %p261_p11 }
  0x1c   : > { %s268_s16 = sand.u32 (!%p262_p12), 1, %s1257_s22   ;;  %s1268_s15 = smov (!%p262_p12), 64  }
  0x1d   : > { %265 = sbr.rel (%p262_p12) target bundleno = 1243 (0x4db), region = 78  ;;  %s1369_s19 = sshll.u32 (!%p262_p12), %s268_s16, 5 }
  0x1e   : > { %s270_s28 = scalar_lea.vmem (!%p262_p12), [#allocation3], %s1369_s19  ;;  %s296_s10 = scalar_lea.vmem (!%p262_p12), [#allocation4], %s1369_s19 }
  0x1f   : > { %s1070_s11 = sshll.u32 (!%p262_p12), %s988_s25, 3  ;;  %s918_s19 = sshll.u32 (!%p262_p12), %s296_s10, 4  ;;  %s919_s19 = int_to_ptr.vmem [resolvable:$true] %s918_s19 }
  0x20   : > { %s917_s14 = scalar_lea.hbm (!%p262_p12), %s1588_s6, %s1070_s11  ;;  %s907_s25 = scalar_lea.sflag (!%p262_p12), [#allocation5], %s268_s16 }
  0x21   : > { %s1548_s17 = sshll.u32 (!%p262_p12), %s917_s14, 4  ;;  %s921_s17 = int_to_ptr.hbm [resolvable:$true] %s1548_s17 }
  0x22   : > { %v322_v4 = vld [vmem:[%s1584_s2 + $0x30] sm:$0xff]  ;;  %v1267_v5 = vmov 0   ;;  %v320_v6 = vld [vmem:[%s1584_s2 + $0x20] sm:$0xff]  ;;  %v1377_v8 = vld [vmem:[%s270_s28 + $0x18] sm:$0xff]  ;;  %vm418_vm0 = vcmask 261120   ;;  %vm532_vm1 = vcmask 523264  }
  0x23   : > { %1168 = vset.pattern.permute.xlu0 %v1267_v5  ;;  %1169 = vset.pattern.permute.xlu1 %v1267_v5  ;;  %v1375_v7 = vld [vmem:[%s270_s28 + $0x10] sm:$0xff]  ;;  %v1379_v9 = vld [vmem:[%s270_s28] sm:$0xff]  ;;  %v1383_v11 = vld [vmem:[%s270_s28 + $0x8] sm:$0xff]  ;;  %s1217_s18 = sshra.s32 %s921_s17, 4  ;;  %s1218_s18 = int_to_ptr.hbm [resolvable:$true] %s1217_s18 }
  0x24   : > { %360 = vperm.xlu0 %1168, %v322_v4   ;;  %350 = vperm.xlu1 %1169, %v320_v6   ;;  %v303_v10 = vpack.c.bf16 %v1377_v8, %v1375_v7  ;;  %v302_v12 = vpack.c.bf16 %v1383_v11, %v1379_v9  ;;  %v323_v13 = vld [vmem:[%s1584_s2 + $0x38] sm:$0xff]  ;;  %v321_v14 = vld [vmem:[%s1584_s2 + $0x28] sm:$0xff]  ;;  %v1073_v15 = vld [vmem:[%s1583_s1] sm:$0xff]  ;;  %s1219_s20 = scalar_lea.hbm %s1218_s18, 32  ;;  %p1224_p2 = scmp.lt.s32.totalorder %s1218_s18, %s1588_s6 }
  0x25   : > { %1170 = vset.pattern.permute.xlu2 %v1267_v5  ;;  %v316_v16 = vld [vmem:[%s1584_s2] sm:$0xff]  ;;  %v318_v17 = vld [vmem:[%s1584_s2 + $0x10] sm:$0xff]  ;;  %v319_v18 = vld [vmem:[%s1584_s2 + $0x18] sm:$0xff]  ;;  %p1220_p13 = scmp.ne.s32.totalorder %s1218_s18, %s1219_s20 }
  0x26   : > { %443 = vmatpush.bf16.msra.mxu0 %v303_v10  ;;  %1122 = vmatpush.bf16.msra.mxu2 %v303_v10  ;;  %v317_v19 = vld [vmem:[%s1584_s2 + $0x8] sm:$0xff]  ;;  %v1075_v21 = vld [vmem:[%s1583_s1 + $0x10] sm:$0xff]  ;;  %v1076_v22 = vld [vmem:[%s1583_s1 + $0x18] sm:$0xff] }
  0x27   : > { %330 = vperm.xlu2 %1170, %v316_v16   ;;  %v1074_v20 = vld [vmem:[%s1583_s1 + $0x8] sm:$0xff]  ;;  %v500_v0 = vld [vmem:[%s1587_s5] sm:$0xff]  ;;  %v327_v16 = vld [vmem:[%s1584_s2 + $0x58] sm:$0xff]  ;;  %p1221_p0 = pnand %p1220_p13, %p1345_p6 }
  0x28   : > { %v1078_v57 = vld [vmem:[%s1583_s1 + $0x28] sm:$0xff] }
  0x29   : > { %v501_v4 = vld [vmem:[%s1587_s5 + $0x8] sm:$0xff]  ;;  %p1222_p1 = pneg %p1221_p0 }
  0x2a   : > { %444 = vmatpush.bf16.msra.mxu0 %v302_v12  ;;  %1123 = vmatpush.bf16.msra.mxu2 %v302_v12  ;;  %v502_v12 = vld [vmem:[%s1587_s5 + $0x10] sm:$0xff] }
  0x2c   : > { %365 = vperm.xlu0 %1168, %v323_v13   ;;  %355 = vperm.xlu1 %1169, %v321_v14  }
  0x2d   : > { %1021 = vmatmul.msk.bf16.vlgmr.msra.gmra.mxu0 %vm418_vm0, %v1073_v15  ;;  %1026 = vmatmul.msk.bf16.vlgmr.msra.gmra.mxu2 %vm418_vm0, %v1078_v57 }
  0x2f   : > { %335 = vperm.xlu2 %1170, %v317_v19  }
  0x34   : > { %340 = vperm.xlu0 %1168, %v318_v17   ;;  %345 = vperm.xlu1 %1169, %v319_v18   ;;  %v503_v17 = vld [vmem:[%s1587_s5 + $0x18] sm:$0xff] }
  0x3d   : > { %1022 = vmatmul.msk.bf16.gmra.mxu0 %vm418_vm0, %v1074_v20 }
  0x4d   : > { %1023 = vmatmul.msk.bf16.gmra.mxu0 %vm418_vm0, %v1075_v21  ;;  %v326_v21 = vld [vmem:[%s1584_s2 + $0x50] sm:$0xff] }
  0x5d   : > { %1024 = vmatmul.msk.bf16.gmra.mxu0 %vm418_vm0, %v1076_v22  ;;  %v1077_v22 = vld [vmem:[%s1583_s1 + $0x20] sm:$0xff] }
  0x6d   : > { %1025 = vmatmul.msk.bf16.gmra.mxu0 %vm418_vm0, %v1077_v22 }
  0x81   : > { %v331_v23 = vpop.permute.xlu2 %330 }
  0x89   : > { %v336_v27 = vpop.permute.xlu2 %335 }
  0x96   : > { %v361_v25 = vpop.permute.xlu0 %360  ;;  %v351_v26 = vpop.permute.xlu1 %350 }
  0x9e   : > { %v366_v32 = vpop.permute.xlu0 %365  ;;  %v356_v33 = vpop.permute.xlu1 %355 }
  0xa6   : > { %v341_v36 = vpop.permute.xlu0 %340  ;;  %v346_v37 = vpop.permute.xlu1 %345 }
  0xaa   : > { %v446_v24 = vpop.f32.mrf.mxu0 }
  0xab   : > { %v447_v29 = vadd.f32 %v446_v24, %v331_v23 }
  0xb0   : > { %v471_v23 = vpop.f32.mrf.mxu2 }
  0xb2   : > { %v448_v28 = vpop.f32.mrf.mxu0 }
  0xb3   : > { %v449_v30 = vadd.f32 %v448_v28, %v336_v27 }
  0xb5   : > { %v1090_v31 = vpack.c.bf16 %v449_v30, %v447_v29 }
  0xb7   : > { %1091 = vst [vmem:[#allocation2 + $0x28] sm:$0xff] %v1090_v31  }
  0xb8   : > { %v473_v24 = vpop.f32.mrf.mxu2 }
  0xba   : > { %v451_v34 = vpop.f32.mrf.mxu0 }
  0xbb   : > { %v452_v39 = vadd.f32 %v451_v34, %v341_v36  ;;  %v325_v34 = vld [vmem:[%s1584_s2 + $0x48] sm:$0xff] }
  0xbe   : > { %v1079_v35 = vld [vmem:[#allocation2 + $0x28] sm:$0xff] }
  0xbf   : > { %564 = vrot.lane.b32.xlu1 %v1079_v35, %s1268_s15 }
  0xc2   : > { %v453_v38 = vpop.f32.mrf.mxu0 }
  0xc3   : > { %v454_v40 = vadd.f32 %v453_v38, %v346_v37  ;;  %v324_v38 = vld [vmem:[%s1584_s2 + $0x40] sm:$0xff] }
  0xc5   : > { %v1095_v41 = vpack.c.bf16 %v454_v40, %v452_v39 }
  0xc7   : > { %1117 = vst [vmem:[#allocation2 + $0x10] sm:$0xff] %v1095_v41  }
  0xca   : > { %v456_v42 = vpop.f32.mrf.mxu0 }
  0xcb   : > { %v457_v44 = vadd.f32 %v456_v42, %v351_v26 }
  0xce   : > { %v1080_v55 = vld [vmem:[#allocation2 + $0x10] sm:$0xff] }
  0xd2   : > { %v458_v43 = vpop.f32.mrf.mxu0 }
  0xd3   : > { %v459_v45 = vadd.f32 %v458_v43, %v356_v33 }
  0xd5   : > { %v1100_v46 = vpack.c.bf16 %v459_v45, %v457_v44 }
  0xd7   : > { %1118 = vst [vmem:[#allocation2 + $0x8] sm:$0xff] %v1100_v46  }
  0xda   : > { %v461_v47 = vpop.f32.mrf.mxu0 }
  0xdb   : > { %v462_v50 = vadd.f32 %v461_v47, %v361_v25 }
  0xde   : > { %v1081_v48 = vld [vmem:[#allocation2 + $0x8] sm:$0xff] }
  0xdf   : > { %568 = vrot.lane.b32.xlu0 %v1081_v48, %s1268_s15  ;;  %v540_v56 = vsel %vm532_vm1, %v1081_v48, 0 }
  0xe2   : > { %v463_v49 = vpop.f32.mrf.mxu0 }
  0xe3   : > { %v464_v51 = vadd.f32 %v463_v49, %v366_v32 }
  0xe5   : > { %v1105_v52 = vpack.c.bf16 %v464_v51, %v462_v50 }
  0xe7   : > { %1119 = vst [vmem:[#allocation2] sm:$0xff] %v1105_v52  }
  0xee   : > { %v1082_v53 = vld [vmem:[#allocation2] sm:$0xff] }
  0xef   : > { %570 = vrot.lane.b32.xlu2 %v1082_v53, %s1268_s15  ;;  %v543_v54 = vsel %vm532_vm1, %v1082_v53, 0 }
  0xf0   : > { %551 = vmatpush.bf16.xpose.msra.mxu1 %v543_v54 }
  0xf7   : > { %566 = vrot.lane.b32.xlu2 %v1080_v55, %s1268_s15 }
  0xf8   : > { %552 = vmatpush.bf16.xpose.msra.mxu1 %v540_v56 }
  0xff   : > { %1043 = vmatmul.msk.bf16.vlgmr.msra.gmra.mxu1 %vm532_vm1, %v1079_v35 }
 0x10f   : > { %1044 = vmatmul.msk.bf16.gmra.mxu1 %vm532_vm1, %v1080_v55 }
 0x131   : > { %v565_v62 = vpop.permute.xlu1 %564 }
 0x149   : > { %v571_v58 = vpop.permute.xlu2 %570 }
 0x14a   : > { %v582_v59 = vsel %vm532_vm1, %v571_v58, 0 }
 0x14b   : > { %590 = vmatpush.bf16.xpose.msrb.mxu2 %v582_v59 }
 0x151   : > { %v569_v60 = vpop.permute.xlu0 %568  ;;  %v567_v63 = vpop.permute.xlu2 %566 }
 0x152   : > { %v579_v61 = vsel %vm532_vm1, %v569_v60, 0 }
 0x153   : > { %591 = vmatpush.bf16.xpose.msrb.mxu2 %v579_v61 }
 0x15a   : > { %1045 = vmatmul.msk.bf16.vlgmr.msrb.gmra.mxu2 %vm532_vm1, %v565_v62 }
 0x16a   : > { %1046 = vmatmul.msk.bf16.gmra.mxu2 %vm532_vm1, %v567_v63 }
 0x17c   : > { %v554_v1 = vpop.f32.mrf.mxu1 }
 0x17d   : > { %v555_v2 = vadd.f32 %v554_v1, %v500_v0 }
 0x17f   : > { %v603_v3 = vsel %vm418_vm0, %v555_v2, -inf }
 0x180   : > { %604 = vmax.xlane.f32.xlu0 %v603_v3 }
 0x184   : > { %v556_v5 = vpop.f32.mrf.mxu1 }
 0x185   : > { %v557_v6 = vadd.f32 %v556_v5, %v501_v4 }
 0x187   : > { %v606_v10 = vsel %vm418_vm0, %v557_v6, -inf }
 0x188   : > { %607 = vmax.xlane.f32.xlu1 %v606_v10 }
 0x18c   : > { %v559_v13 = vpop.f32.mrf.mxu1 }
 0x18d   : > { %v560_v14 = vadd.f32 %v559_v13, %v502_v12 }
 0x18f   : > { %v609_v15 = vsel %vm418_vm0, %v560_v14, -inf }
 0x190   : > { %610 = vmax.xlane.f32.xlu2 %v609_v15 }
 0x194   : > { %v561_v18 = vpop.f32.mrf.mxu1  ;;  %385 = vperm.xlu0 %1168, %v327_v16  }
 0x195   : > { %v562_v19 = vadd.f32 %v561_v18, %v503_v17 }
 0x197   : > { %v612_v20 = vsel %vm418_vm0, %v562_v19, -inf }
 0x198   : > { %613 = vmax.xlane.f32.xlu2 %v612_v20 }
 0x1b0   : > { %380 = vperm.xlu2 %1170, %v326_v21  }
 0x1dd   : > { %v593_v25 = vpop.f32.mrf.mxu2 }
 0x1de   : > { %v594_v26 = vadd.f32 %v593_v25, %v500_v0 }
 0x1e0   : > { %v615_v27 = vsel %vm418_vm0, %v594_v26, -inf }
 0x1e1   : > { %616 = vmax.xlane.f32.xlu0 %v615_v27 }
 0x1e5   : > { %v595_v28 = vpop.f32.mrf.mxu2 }
 0x1e6   : > { %v596_v29 = vadd.f32 %v595_v28, %v501_v4  ;;  %v835_v28 = vld [vmem:[%s1586_s4] sm:$0xff] }
 0x1e8   : > { %v618_v30 = vsel %vm418_vm0, %v596_v29, -inf }
 0x1e9   : > { %619 = vmax.xlane.f32.xlu1 %v618_v30  ;;  %v837_v30 = vld [vmem:[%s1586_s4 + $0x10] sm:$0xff] }
 0x1ed   : > { %v598_v31 = vpop.f32.mrf.mxu2 }
 0x1ee   : > { %v599_v32 = vadd.f32 %v598_v31, %v502_v12 }
 0x1f0   : > { %v621_v33 = vsel %vm418_vm0, %v599_v32, -inf }
 0x1f1   : > { %622 = vmax.xlane.f32.xlu2 %v621_v33 }
 0x1f3   : > { %v605_v42 = vpop.xlane.xlu0 %604 }
 0x1f4   : > { %v627_v44 = vsub.f32 %v555_v2, %v605_v42 }
 0x1f5   : > { %375 = vperm.xlu0 %1168, %v325_v34   ;;  %v600_v58 = vpop.f32.mrf.mxu2 }
 0x1f6   : > { %v635_v45 = vmul.f32 1.442695, %v627_v44  ;;  %v601_v61 = vadd.f32 %v600_v58, %v503_v17  ;;  %v466_v17 = vpop.f32.mrf.mxu0 }
 0x1f8   : > { %v624_v62 = vsel %vm418_vm0, %v601_v61, -inf }
 0x1fb   : > { %v608_v35 = vpop.xlane.xlu1 %607 }
 0x1fc   : > { %v628_v36 = vsub.f32 %v557_v6, %v608_v35 }
 0x1fe   : > { %v637_v37 = vmul.f32 1.442695, %v628_v36  ;;  %v468_v21 = vpop.f32.mrf.mxu0 }
 0x200   : > { %1171 = vpow2.f32 %v637_v37 }
 0x201   : > { %1173 = vpow2.f32 %v635_v45 }
 0x202   : > { %370 = vperm.xlu1 %1169, %v324_v38  }
 0x203   : > { %v611_v39 = vpop.xlane.xlu2 %610 }
 0x204   : > { %v629_v56 = vsub.f32 %v560_v14, %v611_v39 }
 0x206   : > { %v1472_v40 = vpop.eup %1171  ;;  %v386_v46 = vpop.permute.xlu0 %385  ;;  %v639_v59 = vmul.f32 1.442695, %v629_v56 }
 0x207   : > { %v654_v41 = vsel %vm418_vm0, %v1472_v40, 0.0  ;;  %v474_v48 = vadd.f32 %v473_v24, %v386_v46  ;;  %v1476_v53 = vpop.eup %1173 }
 0x208   : > { %655 = vadd.xlane.f32.xlu2 %v654_v41  ;;  %v651_v54 = vsel %vm418_vm0, %v1476_v53, 0.0 }
 0x20b   : > { %v614_v43 = vpop.xlane.xlu2 %613 }
 0x20c   : > { %v630_v50 = vsub.f32 %v562_v19, %v614_v43 }
 0x20e   : > { %v641_v52 = vmul.f32 1.442695, %v630_v50 }
 0x210   : > { %1175 = vpow2.f32 %v641_v52 }
 0x211   : > { %1177 = vpow2.f32 %v639_v59 }
 0x213   : > { %v381_v47 = vpop.permute.xlu2 %380 }
 0x214   : > { %v472_v49 = vadd.f32 %v471_v23, %v381_v47 }
 0x216   : > { %v1115_v51 = vpack.c.bf16 %v474_v48, %v472_v49  ;;  %v1480_v57 = vpop.eup %1175 }
 0x217   : > { %v660_v60 = vsel %vm418_vm0, %v1480_v57, 0.0  ;;  %v1485_v63 = vpop.eup %1177 }
 0x218   : > { %1121 = vst [vmem:[#allocation2 + $0x20] sm:$0xff] %v1115_v51   ;;  %v657_v0 = vsel %vm418_vm0, %v1485_v63, 0.0 }
 0x21f   : > { %652 = vadd.xlane.f32.xlu0 %v651_v54  ;;  %v1084_v55 = vld [vmem:[#allocation2 + $0x20] sm:$0xff] }
 0x220   : > { %737 = vmatpush.bf16.msra.mxu3 %v1084_v55 }
 0x227   : > { %661 = vadd.xlane.f32.xlu0 %v660_v60 }
 0x22c   : > { %625 = vmax.xlane.f32.xlu1 %v624_v62 }
 0x234   : > { %658 = vadd.xlane.f32.xlu1 %v657_v0 }
 0x23b   : > { %766 = vrot.lane.b32.xlu0 %v1084_v55, %s1268_s15 }
 0x254   : > { %v617_v1 = vpop.xlane.xlu0 %616 }
 0x255   : > { %v631_v2 = vsub.f32 %v594_v26, %v617_v1 }
 0x257   : > { %v643_v3 = vmul.f32 1.442695, %v631_v2 }
 0x259   : > { %1179 = vpow2.f32 %v643_v3 }
 0x25c   : > { %v620_v4 = vpop.xlane.xlu1 %619 }
 0x25d   : > { %v632_v5 = vsub.f32 %v596_v29, %v620_v4 }
 0x25f   : > { %v1490_v6 = vpop.eup %1179  ;;  %v645_v10 = vmul.f32 1.442695, %v632_v5 }
 0x260   : > { %v663_v12 = vsel %vm418_vm0, %v1490_v6, 0.0 }
 0x261   : > { %1181 = vpow2.f32 %v645_v10  ;;  %664 = vadd.xlane.f32.xlu2 %v663_v12 }
 0x264   : > { %v623_v13 = vpop.xlane.xlu2 %622 }
 0x265   : > { %v633_v14 = vsub.f32 %v599_v32, %v623_v13 }
 0x267   : > { %v1494_v15 = vpop.eup %1181  ;;  %v647_v16 = vmul.f32 1.442695, %v633_v14  ;;  %v376_v22 = vpop.permute.xlu0 %375 }
 0x268   : > { %v666_v18 = vsel %vm418_vm0, %v1494_v15, 0.0  ;;  %v469_v24 = vadd.f32 %v468_v21, %v376_v22 }
 0x269   : > { %1183 = vpow2.f32 %v647_v16  ;;  %667 = vadd.xlane.f32.xlu1 %v666_v18 }
 0x26f   : > { %v1498_v19 = vpop.eup %1183 }
 0x270   : > { %v669_v20 = vsel %vm418_vm0, %v1498_v19, 0.0 }
 0x271   : > { %670 = vadd.xlane.f32.xlu1 %v669_v20 }
 0x274   : > { %v371_v23 = vpop.permute.xlu1 %370 }
 0x275   : > { %v467_v25 = vadd.f32 %v466_v17, %v371_v23 }
 0x277   : > { %v1110_v26 = vpack.c.bf16 %v469_v24, %v467_v25 }
 0x279   : > { %1120 = vst [vmem:[#allocation2 + $0x18] sm:$0xff] %v1110_v26  }
 0x27b   : > { %v656_v29 = vpop.xlane.xlu2 %655 }
 0x27c   : > { %1185 = vrcp.f32 %v656_v29 }
 0x280   : > { %v1083_v27 = vld [vmem:[#allocation2 + $0x18] sm:$0xff] }
 0x281   : > { %764 = vrot.lane.b32.xlu2 %v1083_v27, %s1268_s15  ;;  %738 = vmatpush.bf16.msra.mxu3 %v1083_v27 }
 0x282   : > { %v1186_v32 = vpop.eup %1185 }
 0x283   : > { %v684_v33 = vmul.f32 %v1186_v32, %v1472_v40 }
 0x285   : > { %v692_v36 = vpack.c.bf16 %v684_v33, %v684_v33 }
 0x287   : > { %v708_v39 = vunpack.c.l.b16 %v692_v36 }
 0x289   : > { %841 = vperm.xlu2 %1170, %v835_v28  }
 0x291   : > { %851 = vperm.xlu2 %1170, %v837_v30  }
 0x292   : > { %v653_v31 = vpop.xlane.xlu0 %652 }
 0x293   : > { %1187 = vrcp.f32 %v653_v31 }
 0x299   : > { %v1188_v34 = vpop.eup %1187 }
 0x29a   : > { %v683_v35 = vmul.f32 %v1188_v34, %v1476_v53  ;;  %v662_v41 = vpop.xlane.xlu0 %661 }
 0x29b   : > { %1189 = vrcp.f32 %v662_v41 }
 0x29c   : > { %v691_v37 = vpack.c.bf16 %v683_v35, %v683_v35 }
 0x29e   : > { %v707_v38 = vunpack.c.l.b16 %v691_v37 }
 0x29f   : > { %v626_v42 = vpop.xlane.xlu1 %625 }
 0x2a0   : > { %v634_v43 = vsub.f32 %v601_v61, %v626_v42  ;;  %v711_v44 = vpack.c.b16 %v708_v39, %v707_v38 }
 0x2a1   : > { %v1190_v47 = vpop.eup %1189 }
 0x2a2   : > { %v649_v45 = vmul.f32 1.442695, %v634_v43  ;;  %1055 = vmatmul.msk.bf16.vlgmr.msra.gmra.mxu3 %vm418_vm0, %v711_v44  ;;  %v686_v49 = vmul.f32 %v1190_v47, %v1480_v57 }
 0x2a4   : > { %1191 = vpow2.f32 %v649_v45  ;;  %v694_v53 = vpack.c.bf16 %v686_v49, %v686_v49  ;;  %v836_v49 = vld [vmem:[%s1586_s4 + $0x8] sm:$0xff] }
 0x2a6   : > { %v710_v56 = vunpack.c.l.b16 %v694_v53 }
 0x2a7   : > { %v659_v46 = vpop.xlane.xlu1 %658 }
 0x2a8   : > { %1193 = vrcp.f32 %v659_v46 }
 0x2aa   : > { %v1192_v40 = vpop.eup %1191 }
 0x2ab   : > { %v672_v48 = vsel %vm418_vm0, %v1192_v40, 0.0 }
 0x2ac   : > { %673 = vadd.xlane.f32.xlu1 %v672_v48 }
 0x2ad   : > { %v767_v50 = vpop.permute.xlu0 %766 }
 0x2ae   : > { %v1194_v51 = vpop.eup %1193  ;;  %782 = vmatpush.bf16.msrb.mxu3 %v767_v50  ;;  %v838_v50 = vld [vmem:[%s1586_s4 + $0x18] sm:$0xff] }
 0x2af   : > { %v685_v52 = vmul.f32 %v1194_v51, %v1485_v63 }
 0x2b1   : > { %v693_v54 = vpack.c.bf16 %v685_v52, %v685_v52 }
 0x2b3   : > { %v709_v55 = vunpack.c.l.b16 %v693_v54 }
 0x2b5   : > { %v712_v58 = vpack.c.b16 %v710_v56, %v709_v55  ;;  %v1085_v55 = vld [vmem:[%s1585_s3] sm:$0xff]  ;;  %v1086_v56 = vld [vmem:[%s1585_s3 + $0x8] sm:$0xff] }
 0x2b7   : > { %1056 = vmatmul.msk.bf16.gmra.mxu3 %vm418_vm0, %v712_v58 }
 0x2d4   : > { %v665_v59 = vpop.xlane.xlu2 %664 }
 0x2d5   : > { %1195 = vrcp.f32 %v665_v59 }
 0x2db   : > { %v1196_v62 = vpop.eup %1195 }
 0x2dc   : > { %v668_v60 = vpop.xlane.xlu1 %667  ;;  %v765_v61 = vpop.permute.xlu2 %764  ;;  %v687_v57 = vmul.f32 %v1196_v62, %v1490_v6 }
 0x2dd   : > { %1197 = vrcp.f32 %v668_v60  ;;  %783 = vmatpush.bf16.msrb.mxu3 %v765_v61 }
 0x2de   : > { %v695_v1 = vpack.c.bf16 %v687_v57, %v687_v57 }
 0x2e0   : > { %v758_v3 = vunpack.c.l.b16 %v695_v1 }
 0x2e3   : > { %v1198_v0 = vpop.eup %1197 }
 0x2e4   : > { %v688_v63 = vmul.f32 %v1198_v0, %v1494_v15  ;;  %v671_v10 = vpop.xlane.xlu1 %670  ;;  %v842_v58 = vpop.permute.xlu2 %841 }
 0x2e5   : > { %1199 = vrcp.f32 %v671_v10 }
 0x2e6   : > { %v696_v2 = vpack.c.bf16 %v688_v63, %v688_v63 }
 0x2e8   : > { %v759_v4 = vunpack.c.l.b16 %v696_v2 }
 0x2ea   : > { %v762_v5 = vpack.c.b16 %v759_v4, %v758_v3 }
 0x2eb   : > { %v1200_v13 = vpop.eup %1199 }
 0x2ec   : > { %1057 = vmatmul.msk.bf16.vlgmr.msrb.gmra.mxu3 %vm418_vm0, %v762_v5  ;;  %v689_v14 = vmul.f32 %v1200_v13, %v1498_v19  ;;  %v852_v63 = vpop.permute.xlu2 %851 }
 0x2ee   : > { %v697_v18 = vpack.c.bf16 %v689_v14, %v689_v14 }
 0x2f0   : > { %v760_v21 = vunpack.c.l.b16 %v697_v18 }
 0x31f   : > { %v674_v12 = vpop.xlane.xlu1 %673 }
 0x320   : > { %1201 = vrcp.f32 %v674_v12 }
 0x325   : > { %v740_v16 = vpop.f32.mrf.mxu3 }
 0x326   : > { %v1202_v17 = vpop.eup %1201  ;;  %v750_v22 = vpack.c.bf16 %v740_v16, %v740_v16 }
 0x327   : > { %v690_v6 = vmul.f32 %v1202_v17, %v1192_v40 }
 0x328   : > { %v803_v26 = vunpack.c.l.b16 %v750_v22 }
 0x329   : > { %v698_v20 = vpack.c.bf16 %v690_v6, %v690_v6 }
 0x32b   : > { %v761_v15 = vunpack.c.l.b16 %v698_v20 }
 0x32d   : > { %v742_v23 = vpop.f32.mrf.mxu3  ;;  %v763_v24 = vpack.c.b16 %v761_v15, %v760_v21 }
 0x32e   : > { %v751_v25 = vpack.c.bf16 %v742_v23, %v742_v23 }
 0x32f   : > { %1058 = vmatmul.msk.bf16.gmra.mxu3 %vm418_vm0, %v763_v24 }
 0x330   : > { %v804_v27 = vunpack.c.l.b16 %v751_v25 }
 0x332   : > { %v807_v28 = vpack.c.b16 %v804_v27, %v803_v26 }
 0x33a   : > { %v745_v29 = vpop.f32.mrf.mxu3 }
 0x33b   : > { %v752_v30 = vpack.c.bf16 %v745_v29, %v745_v29 }
 0x33d   : > { %v805_v32 = vunpack.c.l.b16 %v752_v30 }
 0x342   : > { %v747_v31 = vpop.f32.mrf.mxu3 }
 0x343   : > { %v753_v19 = vpack.c.bf16 %v747_v31, %v747_v31 }
 0x345   : > { %v806_v33 = vunpack.c.l.b16 %v753_v19 }
 0x347   : > { %v808_v34 = vpack.c.b16 %v806_v33, %v805_v32 }
 0x36f   : > { %v785_v35 = vpop.f32.mrf.mxu3 }
 0x370   : > { %v795_v36 = vpack.c.bf16 %v785_v35, %v785_v35 }
 0x372   : > { %v813_v39 = vunpack.c.l.b16 %v795_v36 }
 0x377   : > { %v787_v37 = vpop.f32.mrf.mxu3 }
 0x378   : > { %v796_v38 = vpack.c.bf16 %v787_v37, %v787_v37 }
 0x37a   : > { %v814_v41 = vunpack.c.l.b16 %v796_v38 }
 0x37c   : > { %v817_v42 = vpack.c.b16 %v814_v41, %v813_v39 }
 0x37e   : > { %819 = vrot.lane.b32.xlu1 %v817_v42, %s1268_s15 }
 0x3b2   : > { %v790_v43 = vpop.f32.mrf.mxu3 }
 0x3b3   : > { %v797_v44 = vpack.c.bf16 %v790_v43, %v790_v43 }
 0x3b5   : > { %v815_v47 = vunpack.c.l.b16 %v797_v44 }
 0x3ba   : > { %v792_v45 = vpop.f32.mrf.mxu3 }
 0x3bb   : > { %v798_v46 = vpack.c.bf16 %v792_v45, %v792_v45 }
 0x3bd   : > { %v816_v40 = vunpack.c.l.b16 %v798_v46 }
 0x3bf   : > { %v818_v48 = vpack.c.b16 %v816_v40, %v815_v47 }
 0x3c1   : > { %821 = vrot.lane.b32.xlu0 %v818_v48, %s1268_s15  ;;  %s1223_s15 = scalar_lea.hbm %s1588_s6, 64 }
 0x3c2   : > { %p1225_p3 = scmp.lt.s32.totalorder %s1223_s15, %s1219_s20 }
 0x3c4   : > { %p1226_p4 = por %p1225_p3, %p1224_p2 }
 0x3c6   : > { %p1227_p5 = pnand %p1226_p4, %p1222_p1 }
 0x3c9   : > { %846 = vperm.xlu0 %1168, %v836_v49  }
 0x3d1   : > { %856 = vperm.xlu0 %1168, %v838_v50  }
 0x3f0   : > { %v820_v53 = vpop.permute.xlu1 %819 }
 0x3f1   : > { %v825_v54 = vsel %vm532_vm1, %v807_v28, %v820_v53 }
 0x433   : > { %v822_v51 = vpop.permute.xlu0 %821 }
 0x434   : > { %v829_v52 = vsel %vm532_vm1, %v808_v34, %v822_v51 }
 0x435   : > { %881 = vmatpush.bf16.msrb.mxu1 %v829_v52 }
 0x439   : > { %882 = vmatpush.bf16.msrb.mxu1 %v825_v54 }
 0x43b   : > { %v847_v62 = vpop.permute.xlu0 %846 }
 0x43c   : > { %1067 = vmatmul.msk.bf16.vlgmr.msrb.gmra.mxu1 %vm418_vm0, %v1085_v55 }
 0x44c   : > { %1068 = vmatmul.msk.bf16.gmra.mxu1 %vm418_vm0, %v1086_v56 }
 0x4b9   : > { %v884_v59 = vpop.f32.mrf.mxu1 }
 0x4ba   : > { %v885_v60 = vadd.f32 %v884_v59, %v842_v58 }
 0x4bc   : > { %v898_v61 = vadd.f32 %v885_v60, %v1379_v9  ;;  %v857_v9 = vpop.permute.xlu0 %856 }
 0x4be   : > { %902 = vst [vmem:[%s296_s10] sm:$0xff] %v898_v61 }
 0x4c1   : > { %v886_v57 = vpop.f32.mrf.mxu1 }
 0x4c2   : > { %v887_v0 = vadd.f32 %v886_v57, %v847_v62 }
 0x4c4   : > { %v899_v1 = vadd.f32 %v887_v0, %v1383_v11 }
 0x4c6   : > { %903 = vst [vmem:[%s296_s10 + $0x8] sm:$0xff] %v899_v1 }
 0x4c9   : > { %v889_v2 = vpop.f32.mrf.mxu1 }
 0x4ca   : > { %v890_v3 = vadd.f32 %v889_v2, %v852_v63 }
 0x4cc   : > { %v900_v4 = vadd.f32 %v890_v3, %v1375_v7 }
 0x4ce   : > { %904 = vst [vmem:[%s296_s10 + $0x10] sm:$0xff] %v900_v4 }
 0x4d1   : > { %v891_v11 = vpop.f32.mrf.mxu1 }
 0x4d2   : > { %v892_v5 = vadd.f32 %v891_v11, %v857_v9 }
 0x4d4   : > { %v901_v10 = vadd.f32 %v892_v5, %v1377_v8 }
 0x4d6   : > { %905 = vst [vmem:[%s296_s10 + $0x18] sm:$0xff] %v901_v10 }
 0x4d7   : > { %1230 = shalt.err (!%p1227_p5)
}
 0x4d8   : > { %s1269_s16 = smov 128   ;;  %s1270_s10 = smov 256  }
 0x4d9   : > { %s1271_s11 = smov 8  }
 0x4da   : > { %1124 = dma.vmem_to_hbm [thread:$0]  (%p1345_p6), %s919_s19, 512, %s921_s17, %s907_s25, %s1269_s16, %s1270_s10, %s1271_s11  }
 0x4db PF: > { %s935_s12 = sand.u32 1, %s1253_s21   ;;  %p1127_p7 = pnand %p991_p9, %p1349_p8 }
 0x4dc   : > { %s936_s13 = scalar_lea.sflag [#allocation5], %s935_s12 }
 0x4dd   : > { %p1128_p10 = pneg %p1127_p7 }
 0x4df   : > { %1248 = dma.done.wait (%p1128_p10), %s936_s13, 512  }
 0x4e0   : > { %1250 = vsyncadd (%p1128_p10), %s936_s13, 4294966784  ;;  %p16_p11 = scmp.ge.s32.totalorder %s1330_s27, 4   ;;  %s1591_s21 = smov %s1257_s22 }
 0x4e1   : > { %s1592_s22 = smov %s1261_s23  ;;  %s1593_s23 = smov %s1343_s30 }
 0x4e2   : > { %s1594_s24 = smov %s1330_s27  ;;  %18 = sbr.rel (!%p16_p11) target bundleno = 3 (0x3), region = 122 }
 0x4e7   :  { %942 = vsyncpa [#allocation5], 1 }
 0x4e8   :  { %944 = vsyncpa [#allocation5 + $0x1], 1 }

</bundles_post_ra>
